<compile_context>
chip_gen: v5e
topology: v5e:2x2
jax: 0.10.0
libtpu: 0.0.40
codegen_flags: <defaults>
</compile_context>

<pallas_src>
import functools

import numpy as np

import jax
import jax.numpy as jnp
from jax.experimental import pallas as pl
from jax.experimental.pallas import tpu as pltpu

# ----------------------------------------------------------------------------
# Static layout constants
# ----------------------------------------------------------------------------
CIN_PAD = 8             # input channels padded per conv tap
N_TAPS = 9              # 3x3 conv taps
LAT_PAD = 32            # latent channels padded per decoder shift block
K_MM = 128              # contraction dim of both MXU matmuls (single K=128 dot/stage)
N_MM = 128              # padded output columns (lane-dense 128-wide stores)
_MXU_ROWS = 256         # target matmul rows per grid step (fills v6e/v7x MXU)


def _shift_rows(z, k):
    """Rows m -> m+k; vacated tail rows become zero (rim-masked anyway)."""
    return jnp.concatenate([z[k:, :], jnp.zeros((k, z.shape[1]), z.dtype)], axis=0)


# ----------------------------------------------------------------------------
# Fused Pallas kernel: one grid step = B_blk images, encode + decode
# ----------------------------------------------------------------------------
def _dec_fused_kernel(Wo, lhs_ref, we_ref, be_ref, wd_ref, bd_ref, mask_ref,
                      z_ref, xr_ref):
    # ---- encoder: single (R,128)x(128,128) MXU matmul, f32 accumulate.
    z_acc = jnp.dot(lhs_ref[0], we_ref[...], preferred_element_type=jnp.float32)
    z_acc = jnp.maximum(z_acc + be_ref[...], 0.0)            # bias + ReLU (f32 VPU)
    z_ref[0] = z_acc.astype(jnp.bfloat16)                    # lane-dense bf16 store

    # ---- decoder: ConvTranspose2d(k=3, s=2, p=1, op=1) via 4-phase decomposition,
    # expressed as one (R,128)x(128,128) matmul.  Output block row m = (b, y, x)
    # needs z rows m, m+1, m+Wo, m+Wo+1 (first LAT_PAD lanes), packed along lanes;
    # rows whose shifted source leaves the image are zeroed by the resident mask.
    z0 = z_acc[:, :LAT_PAD]
    z1 = _shift_rows(z0, 1)                                   # z[y, x+1]
    z2 = _shift_rows(z0, Wo)                                  # z[y+1, x]
    z3 = _shift_rows(z0, Wo + 1)                              # z[y+1, x+1]
    dlhs = jnp.concatenate([z0, z1, z2, z3], axis=1) * mask_ref[...]
    d = jnp.dot(dlhs.astype(jnp.bfloat16), wd_ref[...],
                preferred_element_type=jnp.float32)
    xr_ref[0] = jax.nn.sigmoid(d + bd_ref[...]).astype(jnp.bfloat16)


def _pick_batch_block(n, m):
    """Images folded per grid step: fill the MXU rows (<= 256) while keeping
    >= 2 grid steps when the batch allows (keeps both v7x TensorCores busy)."""
    cands = [b for b in range(1, n + 1) if n % b == 0 and b * m <= _MXU_ROWS]
    if not cands:
        return 1
    multi = [b for b in cands if n // b >= 2]
    return max(multi) if multi else max(cands)


def _dec_pallas_call(lhs, we, be, wd, bd, mask, Wo):
    G, R, _ = lhs.shape
    rows = G * R
    flops = 2 * 2 * rows * K_MM * N_MM                      # two matmuls per row block
    bytes_accessed = (lhs.size * 2 + (we.size + wd.size) * 2
                      + (be.size + bd.size + mask.size) * 4
                      + 2 * rows * N_MM * 2)
    # NOTE: if H/W ever scale far beyond the toy size, add a grid axis tiling the
    # row dimension (and re-derive vmem_limit for v7x's 64 MiB VMEM).
    return pl.pallas_call(
        functools.partial(_dec_fused_kernel, Wo),
        out_shape=(jax.ShapeDtypeStruct((G, R, N_MM), jnp.bfloat16),   # z  (padded cols)
                   jax.ShapeDtypeStruct((G, R, N_MM), jnp.bfloat16)),  # xr (padded cols)
        grid=(G,),
        in_specs=[
            pl.BlockSpec((1, R, K_MM), lambda g: (g, 0, 0)),   # per-step encoder LHS
            pl.BlockSpec((K_MM, N_MM), lambda g: (0, 0)),      # resident enc weight
            pl.BlockSpec((1, N_MM), lambda g: (0, 0)),         # resident enc bias
            pl.BlockSpec((K_MM, N_MM), lambda g: (0, 0)),      # resident dec weight
            pl.BlockSpec((1, N_MM), lambda g: (0, 0)),         # resident dec bias
            pl.BlockSpec((R, N_MM), lambda g: (0, 0)),         # resident rim mask
        ],
        out_specs=(pl.BlockSpec((1, R, N_MM), lambda g: (g, 0, 0)),
                   pl.BlockSpec((1, R, N_MM), lambda g: (g, 0, 0))),
        compiler_params=pltpu.CompilerParams(
            dimension_semantics=("parallel",),
            vmem_limit_bytes=32 * 1024 * 1024),
        cost_estimate=pl.CostEstimate(
            flops=flops,
            transcendentals=rows * N_MM,
            bytes_accessed=bytes_accessed),
    )(lhs, we, be, wd, bd, mask)


# ----------------------------------------------------------------------------
# Jitted forward: NCHW glue + im2col packing + fused kernel + unpack
# ----------------------------------------------------------------------------
@functools.partial(jax.jit, static_argnames=("lat",))
def _dec_forward(x_nchw, we, be, wd, bd, *, lat):
    N, C, H, W = x_nchw.shape
    assert H % 2 == 0 and W % 2 == 0 and C <= CIN_PAD
    Ho, Wo = H // 2, W // 2
    M = Ho * Wo
    B_blk = _pick_batch_block(N, M)
    G, R = N // B_blk, B_blk * M

    # Encoder LHS: 9-tap im2col (channels padded to 8) packed along lanes,
    # 72 real + zero-pad to K=128 -> one MXU-filling dot inside the kernel.
    x = jnp.transpose(x_nchw, (0, 2, 3, 1))                        # NHWC
    x = jnp.pad(x, ((0, 0), (1, 1), (1, 1), (0, CIN_PAD - C)))     # (N, H+2, W+2, 8)
    taps = [x[:, kh:kh + H:2, kw:kw + W:2, :]
            for kh in range(3) for kw in range(3)]                 # each (N, Ho, Wo, 8)
    lhs = jnp.concatenate(taps, axis=-1)                           # (N, Ho, Wo, 72)
    lhs = jnp.pad(lhs, ((0, 0), (0, 0), (0, 0), (0, K_MM - N_TAPS * CIN_PAD)))
    lhs = lhs.reshape(G, R, K_MM).astype(jnp.bfloat16)

    # Decoder rim mask: zero shifted-z lanes whose source row leaves the image
    # (x == Wo-1 / y == Ho-1); periodic over the B_blk folded images. Static constant.
    row = np.arange(R)
    ok_c = (row % Wo) < (Wo - 1)
    ok_r = ((row // Wo) % Ho) < (Ho - 1)
    m = np.zeros((R, N_MM), np.float32)
    m[:, 0 * LAT_PAD:1 * LAT_PAD] = 1.0
    m[:, 1 * LAT_PAD:2 * LAT_PAD] = ok_c[:, None]
    m[:, 2 * LAT_PAD:3 * LAT_PAD] = ok_r[:, None]
    m[:, 3 * LAT_PAD:4 * LAT_PAD] = (ok_c & ok_r)[:, None]
    mask = jnp.asarray(m)

    z_pad, xr_pad = _dec_pallas_call(lhs, we, be, wd, bd, mask, Wo)

    # z: (G, R, 128) bf16 -> NCHW (N, lat, Ho, Wo) f32
    z_pad = z_pad.reshape(N, Ho, Wo, N_MM)[..., :lat].astype(jnp.float32)
    z = jnp.transpose(z_pad, (0, 3, 1, 2))
    # xr: columns are (ry, rx, c); sub-pixel interleave back to NCHW (N, C, H, W) f32
    t = xr_pad.reshape(N, Ho, Wo, N_MM)[..., :4 * C].astype(jnp.float32)
    t = t.reshape(N, Ho, Wo, 2, 2, C)
    xr = jnp.transpose(t, (0, 5, 1, 3, 2, 4)).reshape(N, C, H, W)
    return xr, z


# ----------------------------------------------------------------------------
# Dec module (synthetic CAE with deterministic weights)
# ----------------------------------------------------------------------------
class DecPallas:
    """Dec.forward (encode -> decode -> (xr, z)) with a fused Pallas TPU kernel."""

    def __init__(self, key, in_channels=4, latent_dimensions=8, ksize=3):
        assert ksize == 3
        assert in_channels <= CIN_PAD and latent_dimensions <= LAT_PAD
        self.in_channels = in_channels
        self.latent_dimensions = latent_dimensions
        k1, k2, k3, k4 = jax.random.split(key, 4)
        # Encoder Conv2d weight, PyTorch layout [Cout=latent, Cin, kH, kW]
        self.w_enc = 0.1 * jax.random.normal(
            k1, (latent_dimensions, in_channels, ksize, ksize), jnp.float32)
        self.b_enc = 0.1 * jax.random.normal(k2, (latent_dimensions,), jnp.float32)
        # Decoder ConvTranspose2d weight, PyTorch layout [Cin=latent, Cout=in_ch, kH, kW]
        self.w_dec_t = 0.1 * jax.random.normal(
            k3, (latent_dimensions, in_channels, ksize, ksize), jnp.float32)
        self.b_dec = 0.1 * jax.random.normal(k4, (in_channels,), jnp.float32)
        self._pack_weights()

    def _pack_weights(self):
        cin, lat = self.in_channels, self.latent_dimensions
        w_enc = np.asarray(self.w_enc)       # (lat, cin, 3, 3)
        w_dec = np.asarray(self.w_dec_t)     # (lat, cin, 3, 3)

        # Encoder: row block t = 3*kh + kw (8 rows each), columns = latent channel.
        we = np.zeros((K_MM, N_MM), np.float32)
        for kh in range(3):
            for kw in range(3):
                r0 = (3 * kh + kw) * CIN_PAD
                we[r0:r0 + cin, :lat] = w_enc[:, :, kh, kw].T
        be = np.zeros((1, N_MM), np.float32)
        be[0, :lat] = np.asarray(self.b_enc)

        # Decoder 4-phase decomposition: output parity (ry, rx) + input shift (dr, dc)
        # selects exactly one kernel tap (or none).
        def _tap(parity, shift):
            if parity == 0:
                return 1 if shift == 0 else None
            return 2 if shift == 0 else 0

        wd = np.zeros((K_MM, N_MM), np.float32)
        for ry in (0, 1):
            for rx in (0, 1):
                c0 = (2 * ry + rx) * cin
                for dr in (0, 1):
                    for dc in (0, 1):
                        kh, kw = _tap(ry, dr), _tap(rx, dc)
                        if kh is None or kw is None:
                            continue
                        r0 = (2 * dr + dc) * LAT_PAD
                        wd[r0:r0 + lat, c0:c0 + cin] = w_dec[:, :, kh, kw]
        bd = np.zeros((1, N_MM), np.float32)
        bd[0, :4 * cin] = np.tile(np.asarray(self.b_dec), 4)

        self.w_enc_mat = jnp.asarray(we, jnp.bfloat16)   # MXU operands in bf16
        self.b_enc_pad = jnp.asarray(be, jnp.float32)    # bias / activations stay f32
        self.w_dec_mat = jnp.asarray(wd, jnp.bfloat16)
        self.b_dec_pad = jnp.asarray(bd, jnp.float32)

    def forward(self, x_nchw):
        return _dec_forward(x_nchw, self.w_enc_mat, self.b_enc_pad,
                            self.w_dec_mat, self.b_dec_pad,
                            lat=self.latent_dimensions)

    # TODO(synk): Dec.loss (loss_function + kmeans.loss) is external to the forward
    # pass and its definitions are not given; not implemented.


# ----------------------------------------------------------------------------
# Pure-XLA reference (same CAE semantics) for the numerical self-check
# ----------------------------------------------------------------------------
def _reference_forward(x, w_enc, b_enc, w_dec_t, b_dec):
    z = jax.lax.conv_general_dilated(
        x, w_enc, window_strides=(2, 2), padding=((1, 1), (1, 1)),
        dimension_numbers=("NCHW", "OIHW", "NCHW"))
    z = jnp.maximum(z + b_enc.reshape(1, -1, 1, 1), 0.0)
    w = jnp.transpose(jnp.flip(w_dec_t, (2, 3)), (1, 0, 2, 3))
    xr = jax.lax.conv_general_dilated(
        z, w, window_strides=(1, 1), padding=((1, 2), (1, 2)),
        lhs_dilation=(2, 2), dimension_numbers=("NCHW", "OIHW", "NCHW"))
    xr = jax.nn.sigmoid(xr + b_dec.reshape(1, -1, 1, 1))
    return xr, z


if __name__ == "__main__":
    key = jax.random.PRNGKey(0)
    kx, kp = jax.random.split(key)
    x = jax.random.normal(kx, (2, 4, 16, 16), jnp.float32)       # NCHW, PyTorch convention

    model = DecPallas(kp, in_channels=4, latent_dimensions=8)
    xr, z = model.forward(x)
    jax.block_until_ready(xr)
    jax.block_until_ready(z)

    assert xr.shape == (2, 4, 16, 16), xr.shape
    assert z.shape == (2, 8, 8, 8), z.shape

    # numerical self-check against the pure-XLA reference of the same CAE
    xr_ref, z_ref = _reference_forward(x, model.w_enc, model.b_enc,
                                       model.w_dec_t, model.b_dec)
    err_z = float(jnp.max(jnp.abs(z - z_ref)))
    err_x = float(jnp.max(jnp.abs(xr - xr_ref)))
    assert err_z < 5e-2 and err_x < 5e-2, (err_z, err_x)

    print("KERNEL_OK")
</pallas_src>

<mosaic_0001>
module attributes {stable_mosaic.version = 11 : i64} {
  func.func @_dec_fused_kernel(%arg0: i32, %arg1: memref<1x64x128xbf16, #tpu.memory_space<vmem>>, %arg2: memref<128x128xbf16, #tpu.memory_space<vmem>>, %arg3: memref<1x128xf32, #tpu.memory_space<vmem>>, %arg4: memref<128x128xbf16, #tpu.memory_space<vmem>>, %arg5: memref<1x128xf32, #tpu.memory_space<vmem>>, %arg6: memref<64x128xf32, #tpu.memory_space<vmem>>, %arg7: memref<1x64x128xbf16, #tpu.memory_space<vmem>>, %arg8: memref<1x64x128xbf16, #tpu.memory_space<vmem>>) attributes {dimension_semantics = [#tpu.dimension_semantics<parallel>], iteration_bounds = array<i64: 2>, scalar_prefetch = 0 : i64, scratch_operands = 0 : i64, tpu.core_type = #tpu.core_type<tc>, window_params = [{transform_indices = @transform_0, window_bounds = array<i64: 1, 64, 128>}, {pipeline_mode = #tpu.pipeline_mode<synchronous>, transform_indices = @transform_1, window_bounds = array<i64: 128, 128>}, {pipeline_mode = #tpu.pipeline_mode<synchronous>, transform_indices = @transform_2, window_bounds = array<i64: 1, 128>}, {pipeline_mode = #tpu.pipeline_mode<synchronous>, transform_indices = @transform_3, window_bounds = array<i64: 128, 128>}, {pipeline_mode = #tpu.pipeline_mode<synchronous>, transform_indices = @transform_4, window_bounds = array<i64: 1, 128>}, {pipeline_mode = #tpu.pipeline_mode<synchronous>, transform_indices = @transform_5, window_bounds = array<i64: 64, 128>}, {transform_indices = @transform_6, window_bounds = array<i64: 1, 64, 128>}, {transform_indices = @transform_7, window_bounds = array<i64: 1, 64, 128>}]} {
    %c0 = arith.constant 0 : index
    %c0_0 = arith.constant 0 : index
    %c0_1 = arith.constant 0 : index
    %0 = vector.load %arg1[%c0, %c0_0, %c0_1] : memref<1x64x128xbf16, #tpu.memory_space<vmem>>, vector<1x64x128xbf16>
    %1 = vector.shape_cast %0 : vector<1x64x128xbf16> to vector<64x128xbf16>
    %c0_2 = arith.constant 0 : index
    %c0_3 = arith.constant 0 : index
    %2 = vector.load %arg2[%c0_2, %c0_3] : memref<128x128xbf16, #tpu.memory_space<vmem>>, vector<128x128xbf16>
    %cst = arith.constant dense<0.000000e+00> : vector<64x128xf32>
    %3 = tpu.matmul %1, %2, %cst {dimension_numbers = #tpu.dot_dimension_numbers<[1], [0], [0], [1], [0, 0, 1, 1], [], []>} : vector<64x128xbf16>, vector<128x128xbf16>, vector<64x128xf32> -> vector<64x128xf32>
    %c0_4 = arith.constant 0 : index
    %c0_5 = arith.constant 0 : index
    %4 = vector.load %arg3[%c0_4, %c0_5] : memref<1x128xf32, #tpu.memory_space<vmem>>, vector<1x128xf32>
    %5 = vector.broadcast %4 : vector<1x128xf32> to vector<64x128xf32>
    %6 = arith.addf %3, %5 : vector<64x128xf32>
    %cst_6 = arith.constant 0.000000e+00 : f32
    %7 = vector.broadcast %cst_6 : f32 to vector<64x128xf32>
    %8 = arith.maximumf %6, %7 : vector<64x128xf32>
    %9 = arith.truncf %8 : vector<64x128xf32> to vector<64x128xbf16>
    %c0_7 = arith.constant 0 : index
    %c0_8 = arith.constant 0 : index
    %c0_9 = arith.constant 0 : index
    %10 = vector.load %arg7[%c0_7, %c0_8, %c0_9] : memref<1x64x128xbf16, #tpu.memory_space<vmem>>, vector<1x64x128xbf16>
    %11 = vector.shape_cast %10 : vector<1x64x128xbf16> to vector<64x128xbf16>
    %12 = vector.shape_cast %9 : vector<64x128xbf16> to vector<1x64x128xbf16>
    tpu.vector_store %arg7[%c0_7, %c0_8, %c0_9], %12 {strides = array<i32>} : memref<1x64x128xbf16, #tpu.memory_space<vmem>>, vector<1x64x128xbf16>,
    %13 = vector.extract_strided_slice %8 {offsets = [0, 0], sizes = [64, 32], strides = [1, 1]} : vector<64x128xf32> to vector<64x32xf32>
    %14 = vector.extract_strided_slice %13 {offsets = [1, 0], sizes = [63, 32], strides = [1, 1]} : vector<64x32xf32> to vector<63x32xf32>
    %cst_10 = arith.constant 0.000000e+00 : f32
    %15 = vector.broadcast %cst_10 : f32 to vector<1x32xf32>
    %16 = tpu.concatenate %14, %15 in 0 : vector<63x32xf32>, vector<1x32xf32> -> vector<64x32xf32>
    %17 = vector.extract_strided_slice %13 {offsets = [8, 0], sizes = [56, 32], strides = [1, 1]} : vector<64x32xf32> to vector<56x32xf32>
    %cst_11 = arith.constant 0.000000e+00 : f32
    %18 = vector.broadcast %cst_11 : f32 to vector<8x32xf32>
    %19 = tpu.concatenate %17, %18 in 0 : vector<56x32xf32>, vector<8x32xf32> -> vector<64x32xf32>
    %20 = vector.extract_strided_slice %13 {offsets = [9, 0], sizes = [55, 32], strides = [1, 1]} : vector<64x32xf32> to vector<55x32xf32>
    %cst_12 = arith.constant 0.000000e+00 : f32
    %21 = vector.broadcast %cst_12 : f32 to vector<9x32xf32>
    %22 = tpu.concatenate %20, %21 in 0 : vector<55x32xf32>, vector<9x32xf32> -> vector<64x32xf32>
    %23 = tpu.concatenate %13, %16, %19, %22 in 1 : vector<64x32xf32>, vector<64x32xf32>, vector<64x32xf32>, vector<64x32xf32> -> vector<64x128xf32>
    %c0_13 = arith.constant 0 : index
    %c0_14 = arith.constant 0 : index
    %24 = vector.load %arg6[%c0_13, %c0_14] : memref<64x128xf32, #tpu.memory_space<vmem>>, vector<64x128xf32>
    %25 = arith.mulf %23, %24 : vector<64x128xf32>
    %26 = arith.truncf %25 : vector<64x128xf32> to vector<64x128xbf16>
    %c0_15 = arith.constant 0 : index
    %c0_16 = arith.constant 0 : index
    %27 = vector.load %arg4[%c0_15, %c0_16] : memref<128x128xbf16, #tpu.memory_space<vmem>>, vector<128x128xbf16>
    %cst_17 = arith.constant dense<0.000000e+00> : vector<64x128xf32>
    %28 = tpu.matmul %26, %27, %cst_17 {dimension_numbers = #tpu.dot_dimension_numbers<[1], [0], [0], [1], [0, 0, 1, 1], [], []>} : vector<64x128xbf16>, vector<128x128xbf16>, vector<64x128xf32> -> vector<64x128xf32>
    %c0_18 = arith.constant 0 : index
    %c0_19 = arith.constant 0 : index
    %29 = vector.load %arg5[%c0_18, %c0_19] : memref<1x128xf32, #tpu.memory_space<vmem>>, vector<1x128xf32>
    %30 = vector.broadcast %29 : vector<1x128xf32> to vector<64x128xf32>
    %31 = arith.addf %28, %30 : vector<64x128xf32>
    %32 = arith.negf %31 : vector<64x128xf32>
    %33 = math.exp %32 : vector<64x128xf32>
    %cst_20 = arith.constant 1.000000e+00 : f32
    %34 = vector.broadcast %cst_20 : f32 to vector<64x128xf32>
    %35 = arith.addf %34, %33 : vector<64x128xf32>
    %36 = arith.divf %34, %35 : vector<64x128xf32>
    %37 = arith.truncf %36 : vector<64x128xf32> to vector<64x128xbf16>
    %c0_21 = arith.constant 0 : index
    %c0_22 = arith.constant 0 : index
    %c0_23 = arith.constant 0 : index
    %38 = vector.load %arg8[%c0_21, %c0_22, %c0_23] : memref<1x64x128xbf16, #tpu.memory_space<vmem>>, vector<1x64x128xbf16>
    %39 = vector.shape_cast %38 : vector<1x64x128xbf16> to vector<64x128xbf16>
    %40 = vector.shape_cast %37 : vector<64x128xbf16> to vector<1x64x128xbf16>
    tpu.vector_store %arg8[%c0_21, %c0_22, %c0_23], %40 {strides = array<i32>} : memref<1x64x128xbf16, #tpu.memory_space<vmem>>, vector<1x64x128xbf16>,
    return
  }
  func.func @transform_0(%arg0: i32) -> (i32, i32, i32) {
    %c0_i32 = arith.constant 0 : i32
    %c0_i32_0 = arith.constant 0 : i32
    %c0_i32_1 = arith.constant 0 : i32
    return %arg0, %c0_i32, %c0_i32_0 : i32, i32, i32
  }
  func.func @transform_1(%arg0: i32) -> (i32, i32) {
    %c0_i32 = arith.constant 0 : i32
    %c0_i32_0 = arith.constant 0 : i32
    %c0_i32_1 = arith.constant 0 : i32
    return %c0_i32, %c0_i32_0 : i32, i32
  }
  func.func @transform_2(%arg0: i32) -> (i32, i32) {
    %c0_i32 = arith.constant 0 : i32
    %c0_i32_0 = arith.constant 0 : i32
    %c0_i32_1 = arith.constant 0 : i32
    return %c0_i32, %c0_i32_0 : i32, i32
  }
  func.func @transform_3(%arg0: i32) -> (i32, i32) {
    %c0_i32 = arith.constant 0 : i32
    %c0_i32_0 = arith.constant 0 : i32
    %c0_i32_1 = arith.constant 0 : i32
    return %c0_i32, %c0_i32_0 : i32, i32
  }
  func.func @transform_4(%arg0: i32) -> (i32, i32) {
    %c0_i32 = arith.constant 0 : i32
    %c0_i32_0 = arith.constant 0 : i32
    %c0_i32_1 = arith.constant 0 : i32
    return %c0_i32, %c0_i32_0 : i32, i32
  }
  func.func @transform_5(%arg0: i32) -> (i32, i32) {
    %c0_i32 = arith.constant 0 : i32
    %c0_i32_0 = arith.constant 0 : i32
    %c0_i32_1 = arith.constant 0 : i32
    return %c0_i32, %c0_i32_0 : i32, i32
  }
  func.func @transform_6(%arg0: i32) -> (i32, i32, i32) {
    %c0_i32 = arith.constant 0 : i32
    %c0_i32_0 = arith.constant 0 : i32
    %c0_i32_1 = arith.constant 0 : i32
    return %arg0, %c0_i32, %c0_i32_0 : i32, i32, i32
  }
  func.func @transform_7(%arg0: i32) -> (i32, i32, i32) {
    %c0_i32 = arith.constant 0 : i32
    %c0_i32_0 = arith.constant 0 : i32
    %c0_i32_1 = arith.constant 0 : i32
    return %arg0, %c0_i32, %c0_i32_0 : i32, i32, i32
  }
}

</mosaic_0001>

<bundles_post_ra>
// kernel: _dec_forward.1
= control target key start
LH: loop header
LB: loop body
LE: loop exit
PB: predicated region body
PF: predicated region fallthrough
CT: control target
= control target key end

     0   :  { %s1229_s24 = smov 0   ;;  %s1515_s0 = inlined_call_operand.vmem [shape: bf16[2,64,128], index: 0, kind: input, shape index: {}]   ;;  %s1516_s1 = inlined_call_operand.vmem [shape: bf16[128,128], index: 1, kind: input, shape index: {}]   ;;  %s1517_s2 = inlined_call_operand.vmem [shape: f32[1,128], index: 2, kind: input, shape index: {}]   ;;  %s1518_s3 = inlined_call_operand.vmem [shape: bf16[128,128], index: 3, kind: input, shape index: {}]   ;;  %s1519_s4 = inlined_call_operand.vmem [shape: f32[1,128], index: 4, kind: input, shape index: {}]   ;;  %s1520_s5 = inlined_call_operand.vmem [shape: f32[64,128], index: 5, kind: input, shape index: {}]   ;;  %s1521_s6 = inlined_call_operand.vmem [shape: bf16[2,64,128], index: 6, kind: output, shape index: {0}]   ;;  %s1522_s7 = inlined_call_operand.vmem [shape: bf16[2,64,128], index: 7, kind: output, shape index: {1}]  }
   0x1 LB: > { %s945_s25 = sadd.s32 4294967295, %s1183_s24   ;;  %p949_p0 = scmp.ge.s32.totalorder %s1183_s24, 1  ;;  %s1183_s24 = sphi %s1229_s24, %s18_s24  }
   0x2   : > { %p240_p1 = scmp.lt.s32.totalorder %s1183_s24, 3 }
   0x4   : > { %p241_p2 = pnand %p949_p0, %p240_p1 }
   0x5   : > { %p277_p3 = scmp.lt.s32.totalorder (!%p241_p2), %s945_s25, 1  ;;  %s1186_s23 = smov (!%p241_p2), 64  }
   0x6   : > { %244 = sbr.rel (%p241_p2) target bundleno = 530 (0x212), region = 44  ;;  %s1187_s30 = smov (!%p241_p2), 32  }
   0x7   : > { %s1188_s8 = smov (!%p241_p2), 96  }
   0xb   : > { %v1060_v0 = vld [vmem:[%s1516_s1 + $0x38] sm:$0xff]  ;;  %v1059_v1 = vld [vmem:[%s1516_s1 + $0x30] sm:$0xff]  ;;  %v1058_v2 = vld [vmem:[%s1516_s1 + $0x28] sm:$0xff]  ;;  %s1532_s25 = smov (!%p277_p3, %s945_s25), 1  ;;  %v1185_v12 = vmov 0.0   ;;  %vm453_vm0 = vcmask 1046528  }
   0xc   : > { %392 = vmatpush.bf16.msra.mxu0 %v1060_v0  ;;  %1115 = vmatpush.bf16.msra.mxu2 %v1060_v0  ;;  %v1057_v3 = vld [vmem:[%s1516_s1 + $0x20] sm:$0xff]  ;;  %v1056_v4 = vld [vmem:[%s1516_s1 + $0x18] sm:$0xff]  ;;  %v1055_v5 = vld [vmem:[%s1516_s1 + $0x10] sm:$0xff]  ;;  %s1258_s17 = sshll.u32 %s1532_s25, 5  ;;  %vm545_vm1 = vcmask 261120   ;;  %vm554_vm2 = vcmask 523264  }
   0xd   : > { %v1054_v6 = vld [vmem:[%s1516_s1 + $0x8] sm:$0xff]  ;;  %v1053_v7 = vld [vmem:[%s1516_s1] sm:$0xff]  ;;  %s281_s22 = scalar_lea.vmem %s1515_s0, %s1258_s17  ;;  %511 = vrot.lane.b32.xlu0 %v1185_v12, %s1186_s23  ;;  %s1280_s29 = scalar_lea.vmem %s1521_s6, %s1258_s17  ;;  %v1068_v58 = vld [vmem:[%s1518_s3 + $0x38] sm:$0xff]  ;;  %vm563_vm3 = vcmask 785408  }
   0xe   : > { %v1049_v8 = vld [vmem:[%s281_s22] sm:$0xff]  ;;  %v1051_v9 = vld [vmem:[%s281_s22 + $0x10] sm:$0xff]  ;;  %v1050_v10 = vld [vmem:[%s281_s22 + $0x8] sm:$0xff]  ;;  %660 = vmatpush.bf16.msra.mxu1 %v1068_v58  ;;  %1123 = vmatpush.bf16.msra.mxu3 %v1068_v58  ;;  %s1459_s26 = scalar_lea.vmem %s1522_s7, %s1258_s17 }
   0xf   : > { %v1052_v11 = vld [vmem:[%s281_s22 + $0x18] sm:$0xff]  ;;  %v1143_v14 = vld [vmem:[%s1517_s2] ss:$0 sm:$0xff]  ;;  %v1067_v59 = vld [vmem:[%s1518_s3 + $0x30] sm:$0xff] }
  0x10   : > { %393 = vmatpush.bf16.msra.mxu0 %v1059_v1  ;;  %1116 = vmatpush.bf16.msra.mxu2 %v1059_v1  ;;  %v1066_v60 = vld [vmem:[%s1518_s3 + $0x28] sm:$0xff]  ;;  %v1065_v61 = vld [vmem:[%s1518_s3 + $0x20] sm:$0xff]  ;;  %v1064_v62 = vld [vmem:[%s1518_s3 + $0x18] sm:$0xff] }
  0x11   : > { %v1063_v63 = vld [vmem:[%s1518_s3 + $0x10] sm:$0xff]  ;;  %v1062_v0 = vld [vmem:[%s1518_s3 + $0x8] sm:$0xff]  ;;  %v1061_v1 = vld [vmem:[%s1518_s3] sm:$0xff] }
  0x12   : > { %661 = vmatpush.bf16.msra.mxu1 %v1067_v59  ;;  %1124 = vmatpush.bf16.msra.mxu3 %v1067_v59 }
  0x14   : > { %394 = vmatpush.bf16.msra.mxu0 %v1058_v2  ;;  %1117 = vmatpush.bf16.msra.mxu2 %v1058_v2 }
  0x16   : > { %662 = vmatpush.bf16.msra.mxu1 %v1066_v60  ;;  %1125 = vmatpush.bf16.msra.mxu3 %v1066_v60 }
  0x18   : > { %395 = vmatpush.bf16.msra.mxu0 %v1057_v3  ;;  %1118 = vmatpush.bf16.msra.mxu2 %v1057_v3 }
  0x1a   : > { %663 = vmatpush.bf16.msra.mxu1 %v1065_v61  ;;  %1126 = vmatpush.bf16.msra.mxu3 %v1065_v61 }
  0x1c   : > { %396 = vmatpush.bf16.msra.mxu0 %v1056_v4  ;;  %1119 = vmatpush.bf16.msra.mxu2 %v1056_v4 }
  0x1e   : > { %664 = vmatpush.bf16.msra.mxu1 %v1064_v62  ;;  %1127 = vmatpush.bf16.msra.mxu3 %v1064_v62 }
  0x20   : > { %397 = vmatpush.bf16.msra.mxu0 %v1055_v5  ;;  %1120 = vmatpush.bf16.msra.mxu2 %v1055_v5 }
  0x22   : > { %665 = vmatpush.bf16.msra.mxu1 %v1063_v63  ;;  %1128 = vmatpush.bf16.msra.mxu3 %v1063_v63 }
  0x24   : > { %398 = vmatpush.bf16.msra.mxu0 %v1054_v6  ;;  %1121 = vmatpush.bf16.msra.mxu2 %v1054_v6 }
  0x26   : > { %666 = vmatpush.bf16.msra.mxu1 %v1062_v0  ;;  %1129 = vmatpush.bf16.msra.mxu3 %v1062_v0  ;;  %v574_v0 = vld [vmem:[%s1520_s5 + $0x10] sm:$0xff] }
  0x28   : > { %399 = vmatpush.bf16.msra.mxu0 %v1053_v7  ;;  %1122 = vmatpush.bf16.msra.mxu2 %v1053_v7 }
  0x2a   : > { %667 = vmatpush.bf16.msra.mxu1 %v1061_v1  ;;  %1130 = vmatpush.bf16.msra.mxu3 %v1061_v1  ;;  %v575_v1 = vld [vmem:[%s1520_s5 + $0x18] sm:$0xff] }
  0x2b   : > { %400 = vmatmul.bf16.vlgmr.msra.gmra.mxu0 %v1049_v8  ;;  %410 = vmatmul.bf16.vlgmr.msra.gmra.mxu2 %v1051_v9 }
  0x3b   : > { %405 = vmatmul.bf16.gmra.mxu0 %v1050_v10  ;;  %415 = vmatmul.bf16.gmra.mxu2 %v1052_v11 }
  0x7f   : > { %v512_v3 = vpop.permute.xlu0 %511 }
  0xa8   : > { %v401_v13 = vpop.f32.mrf.mxu0 }
  0xa9   : > { %v402_v15 = vadd.f32 %v1143_v14, %v401_v13 }
  0xab   : > { %v1272_v18 = vmax.f32 %v402_v15, 0.0  ;;  %v572_v15 = vld [vmem:[%s1520_s5] sm:$0xff] }
  0xad   : > { %v454_v21 = vrot.slane %v1272_v18, 1 }
  0xae   : > { %v411_v16 = vpop.f32.mrf.mxu2 }
  0xaf   : > { %v412_v22 = vadd.f32 %v1143_v14, %v411_v16 }
  0xb0   : > { %v403_v17 = vpop.f32.mrf.mxu0 }
  0xb1   : > { %v404_v19 = vadd.f32 %v1143_v14, %v403_v17  ;;  %v1291_v29 = vmax.f32 %v412_v22, 0.0  ;;  %v573_v17 = vld [vmem:[%s1520_s5 + $0x8] sm:$0xff] }
  0xb3   : > { %v1274_v20 = vmax.f32 %v404_v19, 0.0  ;;  %v461_v46 = vrot.slane %v1291_v29, 1 }
  0xb5   : > { %v1072_v23 = vpack.c.bf16 %v1274_v20, %v1272_v18  ;;  %497 = vrot.lane.b32.xlu2 %v1274_v20, %s1186_s23  ;;  %v455_v24 = vrot.slane %v1274_v20, 1 }
  0xb6   : > { %v413_v25 = vpop.f32.mrf.mxu2 }
  0xb7   : > { %1073 = vst [vmem:[%s1280_s29] sm:$0xff] %v1072_v23   ;;  %v414_v26 = vadd.f32 %v1143_v14, %v413_v25  ;;  %v456_v27 = vsel %vm453_vm0, %v454_v21, %v455_v24 }
  0xb8   : > { %v406_v28 = vpop.f32.mrf.mxu0  ;;  %472 = vrot.lane.b32.xlu0 %v456_v27, %s1187_s30 }
  0xb9   : > { %v1293_v30 = vmax.f32 %v414_v26, 0.0  ;;  %v407_v31 = vadd.f32 %v1143_v14, %v406_v28 }
  0xbb   : > { %v1082_v32 = vpack.c.bf16 %v1293_v30, %v1291_v29  ;;  %v1297_v33 = vmax.f32 %v407_v31, 0.0  ;;  %505 = vrot.lane.b32.xlu1 %v1293_v30, %s1186_s23  ;;  %v463_v42 = vrot.slane %v1293_v30, 1 }
  0xbd   : > { %1110 = vst [vmem:[%s1280_s29 + $0x10] sm:$0xff] %v1082_v32   ;;  %v457_v35 = vrot.slane %v1297_v33, 1  ;;  %v464_v48 = vsel %vm453_vm0, %v461_v46, %v463_v42 }
  0xbe   : > { %v416_v34 = vpop.f32.mrf.mxu2 }
  0xbf   : > { %v417_v36 = vadd.f32 %v1143_v14, %v416_v34  ;;  %v458_v40 = vsel %vm453_vm0, %v455_v24, %v457_v35  ;;  %v576_v34 = vld [vmem:[%s1520_s5 + $0x20] sm:$0xff] }
  0xc0   : > { %v408_v37 = vpop.f32.mrf.mxu0  ;;  %499 = vrot.lane.b32.xlu0 %v1297_v33, %s1186_s23 }
  0xc1   : > { %v1305_v38 = vmax.f32 %v417_v36, 0.0  ;;  %v409_v39 = vadd.f32 %v1143_v14, %v408_v37 }
  0xc3   : > { %v1308_v41 = vmax.f32 %v409_v39, 0.0  ;;  %474 = vrot.lane.b32.xlu1 %v458_v40, %s1187_s30  ;;  %v465_v43 = vrot.slane %v1305_v38, 1 }
  0xc5   : > { %v1077_v44 = vpack.c.bf16 %v1308_v41, %v1297_v33  ;;  %v466_v45 = vsel %vm453_vm0, %v463_v42, %v465_v43  ;;  %v459_v51 = vrot.slane %v1308_v41, 1 }
  0xc6   : > { %529 = vrot.lane.b32.xlu2 %v466_v45, %s1188_s8  ;;  %v418_v47 = vpop.f32.mrf.mxu2 }
  0xc7   : > { %1109 = vst [vmem:[%s1280_s29 + $0x8] sm:$0xff] %v1077_v44   ;;  %v419_v49 = vadd.f32 %v1143_v14, %v418_v47  ;;  %v460_v53 = vsel %vm453_vm0, %v457_v35, %v459_v51  ;;  %v462_v55 = vsel %vm453_vm0, %v459_v51, %v461_v46  ;;  %v578_v51 = vld [vmem:[%s1520_s5 + $0x30] sm:$0xff] }
  0xc8   : > { %480 = vrot.lane.b32.xlu0 %v464_v48, %s1187_s30 }
  0xc9   : > { %v1321_v50 = vmax.f32 %v419_v49, 0.0 }
  0xcb   : > { %521 = vrot.lane.b32.xlu1 %v458_v40, %s1188_s8  ;;  %v1087_v52 = vpack.c.bf16 %v1321_v50, %v1305_v38  ;;  %v467_v54 = vrot.slane %v1321_v50, 1 }
  0xcd   : > { %1111 = vst [vmem:[%s1280_s29 + $0x18] sm:$0xff] %v1087_v52   ;;  %v468_v56 = vsel %vm453_vm0, %v465_v43, %v467_v54  ;;  %v470_v57 = vsel %vm453_vm0, %v467_v54, 0.0 }
  0xce   : > { %523 = vrot.lane.b32.xlu2 %v460_v53, %s1188_s8 }
  0xd0   : > { %482 = vrot.lane.b32.xlu0 %v466_v45, %s1187_s30 }
  0xd3   : > { %507 = vrot.lane.b32.xlu1 %v1305_v38, %s1186_s23 }
  0xd6   : > { %509 = vrot.lane.b32.xlu2 %v1321_v50, %s1186_s23 }
  0xd8   : > { %476 = vrot.lane.b32.xlu0 %v460_v53, %s1187_s30  ;;  %v579_v53 = vld [vmem:[%s1520_s5 + $0x38] sm:$0xff] }
  0xdb   : > { %478 = vrot.lane.b32.xlu1 %v462_v55, %s1187_s30 }
  0xde   : > { %531 = vrot.lane.b32.xlu2 %v468_v56, %s1188_s8 }
  0xe0   : > { %484 = vrot.lane.b32.xlu0 %v468_v56, %s1187_s30 }
  0xe3   : > { %486 = vrot.lane.b32.xlu1 %v470_v57, %s1187_s30 }
  0xe6   : > { %535 = vrot.lane.b32.xlu2 %v1185_v12, %s1188_s8 }
  0xe8   : > { %503 = vrot.lane.b32.xlu0 %v1291_v29, %s1186_s23 }
  0xeb   : > { %533 = vrot.lane.b32.xlu1 %v470_v57, %s1188_s8 }
  0xee   : > { %501 = vrot.lane.b32.xlu2 %v1308_v41, %s1186_s23 }
  0xf3   : > { %525 = vrot.lane.b32.xlu1 %v462_v55, %s1188_s8 }
  0xf6   : > { %527 = vrot.lane.b32.xlu2 %v464_v48, %s1188_s8 }
 0x10f   : > { %v498_v2 = vpop.permute.xlu2 %497 }
 0x120   : > { %v530_v4 = vpop.permute.xlu2 %529 }
 0x128   : > { %v524_v7 = vpop.permute.xlu2 %523 }
 0x12a   : > { %v473_v5 = vpop.permute.xlu0 %472 }
 0x12b   : > { %v546_v12 = vsel %vm545_vm1, %v1272_v18, %v473_v5 }
 0x12d   : > { %v506_v6 = vpop.permute.xlu1 %505 }
 0x130   : > { %v510_v14 = vpop.permute.xlu2 %509 }
 0x132   : > { %v500_v8 = vpop.permute.xlu0 %499 }
 0x135   : > { %v475_v9 = vpop.permute.xlu1 %474 }
 0x136   : > { %v547_v10 = vsel %vm545_vm1, %v1274_v20, %v475_v9  ;;  %v555_v20 = vsel %vm554_vm2, %v546_v12, %v498_v2 }
 0x137   : > { %v556_v11 = vsel %vm554_vm2, %v547_v10, %v500_v8 }
 0x138   : > { %v565_v16 = vsel %vm563_vm3, %v556_v11, %v524_v7  ;;  %v532_v27 = vpop.permute.xlu2 %531 }
 0x139   : > { %v581_v23 = vmul.f32 %v573_v17, %v565_v16 }
 0x13a   : > { %v481_v13 = vpop.permute.xlu0 %480 }
 0x13b   : > { %v550_v18 = vsel %vm545_vm1, %v1291_v29, %v481_v13  ;;  %v577_v29 = vld [vmem:[%s1520_s5 + $0x28] sm:$0xff] }
 0x13c   : > { %v559_v25 = vsel %vm554_vm2, %v550_v18, %v506_v6  ;;  %v1436_v6 = vld [vmem:[%s1519_s4] ss:$0 sm:$0xff] }
 0x13d   : > { %v522_v19 = vpop.permute.xlu1 %521  ;;  %v568_v32 = vsel %vm563_vm3, %v559_v25, %v530_v4 }
 0x13e   : > { %v564_v21 = vsel %vm563_vm3, %v555_v20, %v522_v19  ;;  %v584_v37 = vmul.f32 %v576_v34, %v568_v32 }
 0x13f   : > { %v580_v22 = vmul.f32 %v572_v15, %v564_v21 }
 0x140   : > { %v536_v43 = vpop.permute.xlu2 %535 }
 0x141   : > { %v588_v24 = vpack.c.bf16 %v581_v23, %v580_v22 }
 0x142   : > { %v483_v26 = vpop.permute.xlu0 %482 }
 0x143   : > { %668 = vmatmul.bf16.vlgmr.msra.gmra.mxu1 %v588_v24  ;;  %v551_v28 = vsel %vm545_vm1, %v1293_v30, %v483_v26 }
 0x145   : > { %v508_v31 = vpop.permute.xlu1 %507 }
 0x146   : > { %v560_v35 = vsel %vm554_vm2, %v551_v28, %v508_v31 }
 0x147   : > { %v569_v36 = vsel %vm563_vm3, %v560_v35, %v532_v27 }
 0x148   : > { %v585_v39 = vmul.f32 %v577_v29, %v569_v36  ;;  %v502_v47 = vpop.permute.xlu2 %501 }
 0x14a   : > { %v477_v40 = vpop.permute.xlu0 %476  ;;  %v590_v42 = vpack.c.bf16 %v585_v39, %v584_v37 }
 0x14b   : > { %v548_v61 = vsel %vm545_vm1, %v1297_v33, %v477_v40 }
 0x14c   : > { %678 = vmatmul.bf16.vlgmr.msra.gmra.mxu3 %v590_v42 }
 0x14d   : > { %v479_v30 = vpop.permute.xlu1 %478 }
 0x150   : > { %v528_v62 = vpop.permute.xlu2 %527 }
 0x152   : > { %v485_v44 = vpop.permute.xlu0 %484 }
 0x153   : > { %v552_v49 = vsel %vm545_vm1, %v1305_v38, %v485_v44  ;;  %v549_v38 = vsel %vm545_vm1, %v1308_v41, %v479_v30  ;;  %v557_v41 = vsel %vm554_vm2, %v548_v61, %v502_v47 }
 0x154   : > { %v561_v55 = vsel %vm554_vm2, %v552_v49, %v510_v14 }
 0x155   : > { %v487_v45 = vpop.permute.xlu1 %486 }
 0x156   : > { %v553_v46 = vsel %vm545_vm1, %v1321_v50, %v487_v45 }
 0x157   : > { %v562_v48 = vsel %vm554_vm2, %v553_v46, %v512_v3 }
 0x158   : > { %v571_v52 = vsel %vm563_vm3, %v562_v48, %v536_v43 }
 0x159   : > { %v587_v58 = vmul.f32 %v579_v53, %v571_v52 }
 0x15a   : > { %v504_v50 = vpop.permute.xlu0 %503 }
 0x15b   : > { %v558_v59 = vsel %vm554_vm2, %v549_v38, %v504_v50 }
 0x15c   : > { %v567_v63 = vsel %vm563_vm3, %v558_v59, %v528_v62 }
 0x15d   : > { %v534_v54 = vpop.permute.xlu1 %533  ;;  %v583_v5 = vmul.f32 %v575_v1, %v567_v63 }
 0x15e   : > { %v570_v56 = vsel %vm563_vm3, %v561_v55, %v534_v54 }
 0x15f   : > { %v586_v57 = vmul.f32 %v578_v51, %v570_v56 }
 0x161   : > { %v591_v60 = vpack.c.bf16 %v587_v58, %v586_v57 }
 0x163   : > { %683 = vmatmul.bf16.gmra.mxu3 %v591_v60 }
 0x165   : > { %v526_v2 = vpop.permute.xlu1 %525 }
 0x166   : > { %v566_v3 = vsel %vm563_vm3, %v557_v41, %v526_v2 }
 0x167   : > { %v582_v4 = vmul.f32 %v574_v0, %v566_v3 }
 0x169   : > { %v589_v33 = vpack.c.bf16 %v583_v5, %v582_v4 }
 0x16b   : > { %673 = vmatmul.bf16.gmra.mxu1 %v589_v33 }
 0x1c0   : > { %v669_v7 = vpop.f32.mrf.mxu1 }
 0x1c1   : > { %v670_v8 = vadd.f32 %v1436_v6, %v669_v7 }
 0x1c3   : > { %v1036_v9 = vmul.f32 -1.442695, %v670_v8 }
 0x1c5   : > { %1145 = vpow2.f32 %v1036_v9 }
 0x1c8   : > { %v671_v10 = vpop.f32.mrf.mxu1 }
 0x1c9   : > { %v672_v11 = vadd.f32 %v1436_v6, %v671_v10 }
 0x1cb   : > { %v1146_v12 = vpop.eup %1145  ;;  %v1037_v13 = vmul.f32 -1.442695, %v672_v11 }
 0x1cc   : > { %v713_v14 = vadd.f32 1.0, %v1146_v12 }
 0x1cd   : > { %1147 = vpow2.f32 %v1037_v13 }
 0x1ce   : > { %1149 = vrcp.f32 %v713_v14  ;;  %vm726_vm5 = vweird.f32 %v713_v14  ;;  %v732_v35 = vand.u32 2147483648, %v713_v14  ;;  %v730_v37 = vand.u32 2147483647, %v713_v14 }
 0x1cf   : > { %v679_v15 = vpop.f32.mrf.mxu3 }
 0x1d0   : > { %v680_v16 = vadd.f32 %v1436_v6, %v679_v15  ;;  %v733_v47 = vor.u32 1.1754944e-38, %v732_v35  ;;  %vm731_vm10 = vcmp.eq.f32.partialorder %v730_v37, 8.507059e+37 }
 0x1d2   : > { %v1040_v17 = vmul.f32 -1.442695, %v680_v16 }
 0x1d3   : > { %v1148_v19 = vpop.eup %1147 }
 0x1d4   : > { %v1150_v20 = vpop.eup %1149  ;;  %v714_v21 = vadd.f32 1.0, %v1148_v19  ;;  %1151 = vpow2.f32 %v1040_v17 }
 0x1d5   : > { %v722_v18 = vmul.f32 %v1150_v20, %v713_v14  ;;  %vm727_vm4 = vweird.f32 %v1150_v20 }
 0x1d6   : > { %1153 = vrcp.f32 %v714_v21  ;;  %v747_v36 = vand.u32 2147483648, %v714_v21  ;;  %v745_v40 = vand.u32 2147483647, %v714_v21  ;;  %vm1445_vm7 = vmor %vm726_vm5, %vm727_vm4  ;;  %vm741_vm8 = vweird.f32 %v714_v21 }
 0x1d7   : > { %v723_v22 = vsub.f32 1.0, %v722_v18  ;;  %v681_v23 = vpop.f32.mrf.mxu3 }
 0x1d8   : > { %v682_v24 = vadd.f32 %v1436_v6, %v681_v23  ;;  %v748_v48 = vor.u32 1.1754944e-38, %v747_v36  ;;  %vm746_vm11 = vcmp.eq.f32.partialorder %v745_v40, 8.507059e+37 }
 0x1d9   : > { %v724_v27 = vmul.f32 %v1150_v20, %v723_v22 }
 0x1da   : > { %v1152_v25 = vpop.eup %1151  ;;  %v1041_v26 = vmul.f32 -1.442695, %v682_v24 }
 0x1db   : > { %v1442_v28 = vadd.f32 1.0, %v1152_v25  ;;  %v725_v34 = vadd.f32 %v1150_v20, %v724_v27 }
 0x1dc   : > { %v1154_v31 = vpop.eup %1153  ;;  %1155 = vpow2.f32 %v1041_v26 }
 0x1dd   : > { %v737_v32 = vmul.f32 %v1154_v31, %v714_v21  ;;  %1157 = vrcp.f32 %v1442_v28  ;;  %vm742_vm6 = vweird.f32 %v1154_v31  ;;  %v729_v44 = vsel %vm1445_vm7, %v1150_v20, %v725_v34 }
 0x1de   : > { %vm743_vm9 = vmor %vm741_vm8, %vm742_vm6  ;;  %v734_v52 = vsel %vm731_vm10, %v733_v47, %v729_v44  ;;  %vm786_vm13 = vweird.f32 %v1442_v28  ;;  %v792_v2 = vand.u32 2147483648, %v1442_v28  ;;  %v790_v4 = vand.u32 2147483647, %v1442_v28 }
 0x1df   : > { %v738_v29 = vsub.f32 1.0, %v737_v32 }
 0x1e0   : > { %v793_v16 = vor.u32 1.1754944e-38, %v792_v2  ;;  %vm791_vm2 = vcmp.eq.f32.partialorder %v790_v4, 8.507059e+37 }
 0x1e1   : > { %v739_v39 = vmul.f32 %v1154_v31, %v738_v29 }
 0x1e2   : > { %v1156_v42 = vpop.eup %1155 }
 0x1e3   : > { %v1449_v43 = vpop.eup %1157  ;;  %v740_v45 = vadd.f32 %v1154_v31, %v739_v39  ;;  %v718_v46 = vadd.f32 1.0, %v1156_v42 }
 0x1e4   : > { %v782_v49 = vmul.f32 %v1449_v43, %v1442_v28  ;;  %vm787_vm12 = vweird.f32 %v1449_v43 }
 0x1e5   : > { %v744_v51 = vsel %vm743_vm9, %v1154_v31, %v740_v45  ;;  %1159 = vrcp.f32 %v718_v46  ;;  %v807_v41 = vand.u32 2147483648, %v718_v46  ;;  %v805_v33 = vand.u32 2147483647, %v718_v46  ;;  %vm1471_vm15 = vmor %vm786_vm13, %vm787_vm12 }
 0x1e6   : > { %v749_v53 = vsel %vm746_vm11, %v748_v48, %v744_v51  ;;  %v783_v54 = vsub.f32 1.0, %v782_v49  ;;  %v684_v55 = vpop.f32.mrf.mxu3  ;;  %vm801_vm0 = vweird.f32 %v718_v46 }
 0x1e7   : > { %v1092_v50 = vpack.c.bf16 %v749_v53, %v734_v52  ;;  %v685_v56 = vadd.f32 %v1436_v6, %v684_v55  ;;  %v808_v17 = vor.u32 1.1754944e-38, %v807_v41  ;;  %vm806_vm3 = vcmp.eq.f32.partialorder %v805_v33, 8.507059e+37 }
 0x1e8   : > { %v674_v57 = vpop.f32.mrf.mxu1  ;;  %v784_v59 = vmul.f32 %v1449_v43, %v783_v54 }
 0x1e9   : > { %1093 = vst [vmem:[%s1459_s26] sm:$0xff] %v1092_v50   ;;  %v1042_v58 = vmul.f32 -1.442695, %v685_v56  ;;  %v675_v38 = vadd.f32 %v1436_v6, %v674_v57 }
 0x1ea   : > { %v785_v63 = vadd.f32 %v1449_v43, %v784_v59 }
 0x1eb   : > { %v1160_v60 = vpop.eup %1159  ;;  %1161 = vpow2.f32 %v1042_v58  ;;  %v1038_v61 = vmul.f32 -1.442695, %v675_v38 }
 0x1ec   : > { %v797_v62 = vmul.f32 %v1160_v60, %v718_v46  ;;  %vm802_vm14 = vweird.f32 %v1160_v60  ;;  %v789_v12 = vsel %vm1471_vm15, %v1449_v43, %v785_v63 }
 0x1ed   : > { %1163 = vpow2.f32 %v1038_v61  ;;  %vm803_vm1 = vmor %vm801_vm0, %vm802_vm14 }
 0x1ee   : > { %v798_v0 = vsub.f32 1.0, %v797_v62  ;;  %v686_v1 = vpop.f32.mrf.mxu3 }
 0x1ef   : > { %v687_v3 = vadd.f32 %v1436_v6, %v686_v1 }
 0x1f0   : > { %v799_v5 = vmul.f32 %v1160_v60, %v798_v0  ;;  %v676_v7 = vpop.f32.mrf.mxu1 }
 0x1f1   : > { %v1162_v8 = vpop.eup %1161  ;;  %v1043_v10 = vmul.f32 -1.442695, %v687_v3  ;;  %v677_v11 = vadd.f32 %v1436_v6, %v676_v7  ;;  %v794_v6 = vsel %vm791_vm2, %v793_v16, %v789_v12 }
 0x1f2   : > { %v800_v13 = vadd.f32 %v1160_v60, %v799_v5  ;;  %v1479_v14 = vadd.f32 1.0, %v1162_v8 }
 0x1f3   : > { %v1164_v15 = vpop.eup %1163  ;;  %1165 = vpow2.f32 %v1043_v10  ;;  %v1039_v19 = vmul.f32 -1.442695, %v677_v11 }
 0x1f4   : > { %v804_v20 = vsel %vm803_vm1, %v1160_v60, %v800_v13  ;;  %1167 = vrcp.f32 %v1479_v14  ;;  %v1482_v18 = vadd.f32 1.0, %v1164_v15  ;;  %v822_v37 = vand.u32 2147483648, %v1479_v14 }
 0x1f5   : > { %v809_v21 = vsel %vm806_vm3, %v808_v17, %v804_v20  ;;  %1169 = vpow2.f32 %v1039_v19  ;;  %vm816_vm4 = vweird.f32 %v1479_v14  ;;  %v820_v43 = vand.u32 2147483647, %v1479_v14 }
 0x1f6   : > { %v1102_v22 = vpack.c.bf16 %v809_v21, %v794_v6  ;;  %1171 = vrcp.f32 %v1482_v18  ;;  %v823_v45 = vor.u32 1.1754944e-38, %v822_v37  ;;  %vm756_vm6 = vweird.f32 %v1482_v18 }
 0x1f7   : > { %v760_v48 = vand.u32 2147483647, %v1482_v18  ;;  %v762_v54 = vand.u32 2147483648, %v1482_v18  ;;  %vm821_vm13 = vcmp.eq.f32.partialorder %v820_v43, 8.507059e+37 }
 0x1f8   : > { %1113 = vst [vmem:[%s1459_s26 + $0x10] sm:$0xff] %v1102_v22  }
 0x1f9   : > { %v1166_v23 = vpop.eup %1165  ;;  %v763_v2 = vor.u32 1.1754944e-38, %v762_v54  ;;  %vm761_vm2 = vcmp.eq.f32.partialorder %v760_v48, 8.507059e+37 }
 0x1fa   : > { %v1168_v24 = vpop.eup %1167  ;;  %v720_v25 = vadd.f32 1.0, %v1166_v23 }
 0x1fb   : > { %v1170_v26 = vpop.eup %1169  ;;  %v812_v27 = vmul.f32 %v1168_v24, %v1479_v14  ;;  %vm817_vm5 = vweird.f32 %v1168_v24 }
 0x1fc   : > { %1173 = vrcp.f32 %v720_v25  ;;  %v1172_v28 = vpop.eup %1171  ;;  %v716_v32 = vadd.f32 1.0, %v1170_v26  ;;  %v837_v46 = vand.u32 2147483648, %v720_v25  ;;  %v835_v51 = vand.u32 2147483647, %v720_v25  ;;  %vm1495_vm8 = vmor %vm816_vm4, %vm817_vm5 }
 0x1fd   : > { %v813_v31 = vsub.f32 1.0, %v812_v27  ;;  %v752_v34 = vmul.f32 %v1172_v28, %v1482_v18  ;;  %vm757_vm9 = vweird.f32 %v1172_v28  ;;  %vm831_vm10 = vweird.f32 %v720_v25 }
 0x1fe   : > { %1175 = vrcp.f32 %v716_v32  ;;  %v777_v57 = vand.u32 2147483648, %v716_v32  ;;  %v838_v58 = vor.u32 1.1754944e-38, %v837_v46  ;;  %v775_v59 = vand.u32 2147483647, %v716_v32  ;;  %vm1504_vm14 = vmor %vm756_vm6, %vm757_vm9 }
 0x1ff   : > { %v753_v29 = vsub.f32 1.0, %v752_v34  ;;  %v814_v35 = vmul.f32 %v1168_v24, %v813_v31  ;;  %vm836_vm15 = vcmp.eq.f32.partialorder %v835_v51, 8.507059e+37  ;;  %vm771_vm0 = vweird.f32 %v716_v32 }
 0x200   : > { %v778_v3 = vor.u32 1.1754944e-38, %v777_v57  ;;  %vm776_vm3 = vcmp.eq.f32.partialorder %v775_v59, 8.507059e+37 }
 0x201   : > { %v754_v40 = vmul.f32 %v1172_v28, %v753_v29  ;;  %v815_v30 = vadd.f32 %v1168_v24, %v814_v35 }
 0x202   : > { %v1174_v36 = vpop.eup %1173 }
 0x203   : > { %v827_v39 = vmul.f32 %v1174_v36, %v720_v25  ;;  %vm832_vm7 = vweird.f32 %v1174_v36  ;;  %v755_v53 = vadd.f32 %v1172_v28, %v754_v40  ;;  %v819_v50 = vsel %vm1495_vm8, %v1168_v24, %v815_v30 }
 0x204   : > { %v1176_v42 = vpop.eup %1175  ;;  %vm833_vm11 = vmor %vm831_vm10, %vm832_vm7  ;;  %v824_v62 = vsel %vm821_vm13, %v823_v45, %v819_v50 }
 0x205   : > { %v828_v44 = vsub.f32 1.0, %v827_v39  ;;  %v767_v47 = vmul.f32 %v1176_v42, %v716_v32  ;;  %vm772_vm12 = vweird.f32 %v1176_v42  ;;  %v759_v63 = vsel %vm1504_vm14, %v1172_v28, %v755_v53 }
 0x206   : > { %vm773_vm1 = vmor %vm771_vm0, %vm772_vm12  ;;  %v764_v5 = vsel %vm761_vm2, %v763_v2, %v759_v63 }
 0x207   : > { %v829_v49 = vmul.f32 %v1174_v36, %v828_v44  ;;  %v768_v55 = vsub.f32 1.0, %v767_v47 }
 0x209   : > { %v830_v56 = vadd.f32 %v1174_v36, %v829_v49  ;;  %v769_v38 = vmul.f32 %v1176_v42, %v768_v55 }
 0x20b   : > { %v834_v61 = vsel %vm833_vm11, %v1174_v36, %v830_v56  ;;  %v770_v1 = vadd.f32 %v1176_v42, %v769_v38 }
 0x20c   : > { %v839_v0 = vsel %vm836_vm15, %v838_v58, %v834_v61 }
 0x20d   : > { %v1107_v41 = vpack.c.bf16 %v839_v0, %v824_v62  ;;  %v774_v4 = vsel %vm773_vm1, %v1176_v42, %v770_v1 }
 0x20e   : > { %v779_v33 = vsel %vm776_vm3, %v778_v3, %v774_v4 }
 0x20f   : > { %1114 = vst [vmem:[%s1459_s26 + $0x18] sm:$0xff] %v1107_v41   ;;  %v1097_v7 = vpack.c.bf16 %v779_v33, %v764_v5 }
 0x211   : > { %1112 = vst [vmem:[%s1459_s26 + $0x8] sm:$0xff] %v1097_v7  }
 0x212 PF: > { %s18_s24 = sadd.s32 1, %s1183_s24  }
 0x213   : > { %p15_p4 = scmp.ge.s32.totalorder %s18_s24, 4  }
 0x215   :  { %17 = sbr.rel (!%p15_p4) target bundleno = 1 (0x1), region = 86 }

</bundles_post_ra>
